<compile_context>
chip_gen: v7x
topology: tpu7x:2x2x1
jax: 0.10.0
libtpu: 0.0.40
codegen_flags: <defaults>
</compile_context>

<pallas_src>
import jax
import jax.numpy as jnp
from jax.experimental import pallas as pl
from jax.experimental.pallas import tpu as pltpu


def _round_up(x, m):
    return ((x + m - 1) // m) * m


def _cdiv(a, b):
    return (a + b - 1) // b


def _make_gemm_kernel(*, norm_mode, w_resident, tc, gc, eps, mxu_dtype):
    """norm_mode: 'fused' -> compute inv column norm from the W tile in-kernel (gn == 1)
                  'input' -> inv passed as an extra [1, tc] input (rare N > tn fallback)
                  'none'  -> plain linear layer
    """

    def body(x_ref, w_ref, b_ref, o_ref, inv_ref):
        k = pl.program_id(2)

        if w_resident:
            # W block spans the full padded C; slice the current k chunk in VMEM.
            w = w_ref[:, pl.ds(pl.multiple_of(k * tc, 128), tc)]
        else:
            w = w_ref[...]

        x = x_ref[...].astype(jnp.float32)
        if norm_mode == "fused":
            wf = w.astype(jnp.float32)
            # Per-column (axis=0) inverse L2 norm; valid because this tile covers the
            # full zero-padded N extent.  rsqrt runs on the EUP.
            inv = jax.lax.rsqrt(jnp.sum(wf * wf, axis=0, keepdims=True) + eps)
            x = x * inv                                    # fold the norm into x, not W
        elif norm_mode == "input":
            x = x * inv_ref[...]

        # Contract the last dims of x [tb, tc] and W [tn, tc]: the natural "x @ W.T"
        # form for the MXU (no XLU transpose of the [N, C] weight tile).
        contrib = jax.lax.dot_general(
            x.astype(mxu_dtype),
            w.astype(mxu_dtype),
            dimension_numbers=(((1,), (1,)), ((), ())),
            preferred_element_type=jnp.float32,
        )                                                   # [tb, tn] f32

        if gc == 1:
            o_ref[...] = (contrib + b_ref[...].astype(jnp.float32)).astype(o_ref.dtype)
        else:
            @pl.when(k == 0)
            def _():
                o_ref[...] = jnp.zeros_like(o_ref)

            o_ref[...] += contrib.astype(o_ref.dtype)

            @pl.when(k == pl.num_programs(2) - 1)
            def _():
                o_ref[...] += b_ref[...].astype(o_ref.dtype)

    if norm_mode == "input":
        def kernel(x_ref, inv_ref, w_ref, b_ref, o_ref):
            body(x_ref, w_ref, b_ref, o_ref, inv_ref)
    else:
        def kernel(x_ref, w_ref, b_ref, o_ref):
            body(x_ref, w_ref, b_ref, o_ref, None)
    return kernel


def classifier_forward(x, weight, bias, norm_flag=True, *,
                       tb=128, tn=256, tc=2048,
                       mxu_dtype=jnp.bfloat16, eps=1e-12):
    """Classifier.forward.  x: [B, C], weight: [N, C], bias: [N] -> [B, N] f32."""
    B, C = x.shape
    N, Cw = weight.shape
    assert C == Cw, "weight in_features mismatch"

    # Tile sizes aligned to TPU granularity (sublane 8, lane 128), clamped to extents.
    tb = min(tb, _round_up(B, 8))
    tn = min(tn, _round_up(N, 128))
    tc = min(tc, _round_up(C, 128))

    # v7x megacore: if the grid would otherwise have a single parallel step, split B into
    # two tiles so both TensorCores get work (harmless on single-TC v5e/v6e).
    if _round_up(B, tb) // tb == 1 and _round_up(N, tn) // tn == 1 and B >= 16:
        tb = _round_up(_cdiv(B, 2), 8)

    Bp, Np, Cp = _round_up(B, tb), _round_up(N, tn), _round_up(C, tc)
    gb, gn, gc = Bp // tb, Np // tn, Cp // tc

    # Conditional zero-padding: typical shapes feed x to the kernel as-is; only the tiny
    # weight/bias get lane padding so the output store is lane-dense.  Zero pads keep
    # column norms and matmul contributions exact.
    def _pad2(a, r, c):
        return jnp.pad(a, ((0, r), (0, c))) if (r or c) else a

    x_p = _pad2(x.astype(jnp.float32), Bp - B, Cp - C)
    w_p = _pad2(weight.astype(jnp.float32), Np - N, Cp - C)
    b_p = _pad2(bias.reshape(1, N).astype(jnp.float32), 0, Np - N)

    if not norm_flag:
        norm_mode = "none"
    elif gn == 1:
        norm_mode = "fused"          # the classifier case: norm computed in-kernel
    else:
        norm_mode = "input"          # rare N > tn fallback: one extra read of W here
    inv = None
    if norm_mode == "input":
        inv = jax.lax.rsqrt(jnp.sum(w_p * w_p, axis=0, keepdims=True) + eps)

    # Keep the whole (tn, Cp) W slab resident across B/k tiles when C is k-tiled, as long
    # as the double-buffered footprint stays well inside the 32 MiB scoped-VMEM default
    # (valid for v5e/v6e and v7x's halved 64 MiB physical VMEM alike).  With gc == 1 the
    # (j, k) block index is already constant over i and k, so W is resident without this.
    w_resident = (gc > 1) and (2 * tn * Cp * 4 <= 8 * 1024 * 1024)

    x_spec = pl.BlockSpec((tb, tc), lambda i, j, k: (i, k))
    b_spec = pl.BlockSpec((1, tn), lambda i, j, k: (0, j))
    if w_resident:
        w_spec = pl.BlockSpec((tn, Cp), lambda i, j, k: (j, 0))
    else:
        w_spec = pl.BlockSpec((tn, tc), lambda i, j, k: (j, k))

    if norm_mode == "input":
        inputs = (x_p, inv, w_p, b_p)
        in_specs = [x_spec,
                    pl.BlockSpec((1, tc), lambda i, j, k: (0, k)),
                    w_spec, b_spec]
    else:
        inputs = (x_p, w_p, b_p)
        in_specs = [x_spec, w_spec, b_spec]

    out_p = pl.pallas_call(
        _make_gemm_kernel(norm_mode=norm_mode, w_resident=w_resident, tc=tc, gc=gc,
                          eps=eps, mxu_dtype=mxu_dtype),
        out_shape=jax.ShapeDtypeStruct((Bp, Np), jnp.float32),
        grid=(gb, gn, gc),
        in_specs=in_specs,
        out_specs=pl.BlockSpec((tb, tn), lambda i, j, k: (i, j)),
        compiler_params=pltpu.CompilerParams(
            dimension_semantics=("parallel", "parallel", "arbitrary")),
    )(*inputs)

    if Bp == B and Np == N:
        return out_p
    return out_p[:B, :N]


if __name__ == "__main__":
    # Classifier(in_channels=512, num_classes=2), small batch.
    B, C, N = 16, 512, 2

    key = jax.random.PRNGKey(0)
    kx, kw = jax.random.split(key)
    x = jax.random.normal(kx, (B, C), dtype=jnp.float32)
    weight = 0.01 * jax.random.normal(kw, (N, C), dtype=jnp.float32)   # .normal_(0, 0.01)
    bias = jnp.zeros((N,), dtype=jnp.float32)                          # .fill_(0.0)

    hi = jax.lax.Precision.HIGHEST
    col_norm = jnp.sqrt(jnp.sum(weight * weight, axis=0, keepdims=True))
    ref_norm = jnp.matmul(x, (weight / col_norm).T, precision=hi) + bias[None, :]
    ref_plain = jnp.matmul(x, weight.T, precision=hi) + bias[None, :]

    # 1) norm_flag=True, default bf16 MXU operands (f32 accumulation) -> loose tolerance.
    out = jax.block_until_ready(classifier_forward(x, weight, bias, norm_flag=True))
    assert out.shape == (B, N)
    assert jnp.allclose(out, ref_norm, atol=2e-1, rtol=2e-2), \
        float(jnp.max(jnp.abs(out - ref_norm)))

    # 2) norm_flag=True, f32 MXU operands -> matches the f32 PyTorch reference tightly.
    out_f32 = jax.block_until_ready(
        classifier_forward(x, weight, bias, norm_flag=True, mxu_dtype=jnp.float32))
    assert jnp.allclose(out_f32, ref_norm, atol=2e-3, rtol=2e-3), \
        float(jnp.max(jnp.abs(out_f32 - ref_norm)))

    # 3) norm_flag=False path.
    out_plain = jax.block_until_ready(
        classifier_forward(x, weight, bias, norm_flag=False, mxu_dtype=jnp.float32))
    assert jnp.allclose(out_plain, ref_plain, atol=2e-3, rtol=2e-3), \
        float(jnp.max(jnp.abs(out_plain - ref_plain)))

    # 4) Larger C exercises the k-tiled grid (gc > 1) with the resident W slab.
    C2 = 4096
    kx2, kw2 = jax.random.split(jax.random.PRNGKey(1))
    x2 = jax.random.normal(kx2, (B, C2), dtype=jnp.float32)
    w2 = 0.01 * jax.random.normal(kw2, (N, C2), dtype=jnp.float32)
    b2 = jnp.zeros((N,), dtype=jnp.float32)
    out2 = jax.block_until_ready(
        classifier_forward(x2, w2, b2, norm_flag=True, mxu_dtype=jnp.float32))
    ref2 = jnp.matmul(
        x2, (w2 / jnp.sqrt(jnp.sum(w2 * w2, axis=0, keepdims=True))).T,
        precision=hi) + b2[None, :]
    assert jnp.allclose(out2, ref2, atol=2e-3, rtol=2e-3), \
        float(jnp.max(jnp.abs(out2 - ref2)))

    # 5) N > tn fallback (norm folded into x via a precomputed [1, C] inv input).
    N3, C3, B3 = 384, 256, 8
    kx3, kw3 = jax.random.split(jax.random.PRNGKey(2))
    x3 = jax.random.normal(kx3, (B3, C3), dtype=jnp.float32)
    w3 = 0.01 * jax.random.normal(kw3, (N3, C3), dtype=jnp.float32)
    b3 = 0.1 * jnp.ones((N3,), dtype=jnp.float32)
    out3 = jax.block_until_ready(
        classifier_forward(x3, w3, b3, norm_flag=True, mxu_dtype=jnp.float32))
    ref3 = jnp.matmul(
        x3, (w3 / jnp.sqrt(jnp.sum(w3 * w3, axis=0, keepdims=True))).T,
        precision=hi) + b3[None, :]
    assert jnp.allclose(out3, ref3, atol=2e-3, rtol=2e-3), \
        float(jnp.max(jnp.abs(out3 - ref3)))

    print("KERNEL_OK")
</pallas_src>

<mosaic_0001>
module attributes {stable_mosaic.version = 11 : i64} {
  func.func @kernel(%arg0: i32, %arg1: i32, %arg2: i32, %arg3: memref<8x512xf32, #tpu.memory_space<vmem>>, %arg4: memref<128x512xf32, #tpu.memory_space<vmem>>, %arg5: memref<1x128xf32, #tpu.memory_space<vmem>>, %arg6: memref<8x128xf32, #tpu.memory_space<vmem>>) attributes {dimension_semantics = [#tpu.dimension_semantics<parallel>, #tpu.dimension_semantics<parallel>, #tpu.dimension_semantics<arbitrary>], iteration_bounds = array<i64: 2, 1, 1>, scalar_prefetch = 0 : i64, scratch_operands = 0 : i64, tpu.core_type = #tpu.core_type<tc>, window_params = [{transform_indices = @transform_0, window_bounds = array<i64: 8, 512>}, {transform_indices = @transform_1, window_bounds = array<i64: 128, 512>}, {transform_indices = @transform_2, window_bounds = array<i64: 1, 128>}, {transform_indices = @transform_3, window_bounds = array<i64: 8, 128>}]} {
    %c0 = arith.constant 0 : index
    %c0_0 = arith.constant 0 : index
    %0 = vector.load %arg4[%c0, %c0_0] : memref<128x512xf32, #tpu.memory_space<vmem>>, vector<128x512xf32>
    %c0_1 = arith.constant 0 : index
    %c0_2 = arith.constant 0 : index
    %1 = vector.load %arg3[%c0_1, %c0_2] : memref<8x512xf32, #tpu.memory_space<vmem>>, vector<8x512xf32>
    %2 = arith.mulf %0, %0 : vector<128x512xf32>
    %cst = arith.constant dense<0.000000e+00> : vector<512xf32>
    %3 = vector.multi_reduction <add>, %2, %cst [0] : vector<128x512xf32> to vector<512xf32>
    %4 = vector.shape_cast %3 : vector<512xf32> to vector<1x512xf32>
    %cst_3 = arith.constant 9.99999996E-13 : f32
    %5 = vector.broadcast %cst_3 : f32 to vector<1x512xf32>
    %6 = arith.addf %4, %5 : vector<1x512xf32>
    %7 = math.rsqrt %6 : vector<1x512xf32>
    %8 = vector.broadcast %7 : vector<1x512xf32> to vector<8x512xf32>
    %9 = arith.mulf %1, %8 : vector<8x512xf32>
    %10 = arith.truncf %9 : vector<8x512xf32> to vector<8x512xbf16>
    %11 = arith.truncf %0 : vector<128x512xf32> to vector<128x512xbf16>
    %cst_4 = arith.constant dense<0.000000e+00> : vector<8x128xf32>
    %12 = tpu.matmul %10, %11, %cst_4 {dimension_numbers = #tpu.dot_dimension_numbers<[1], [1], [0], [0], [0, 0, 1, 0], [], []>} : vector<8x512xbf16>, vector<128x512xbf16>, vector<8x128xf32> -> vector<8x128xf32>
    %c0_5 = arith.constant 0 : index
    %c0_6 = arith.constant 0 : index
    %13 = vector.load %arg5[%c0_5, %c0_6] : memref<1x128xf32, #tpu.memory_space<vmem>>, vector<1x128xf32>
    %14 = vector.broadcast %13 : vector<1x128xf32> to vector<8x128xf32>
    %15 = arith.addf %12, %14 : vector<8x128xf32>
    %c0_7 = arith.constant 0 : index
    %c0_8 = arith.constant 0 : index
    %16 = vector.load %arg6[%c0_7, %c0_8] : memref<8x128xf32, #tpu.memory_space<vmem>>, vector<8x128xf32>
    tpu.vector_store %arg6[%c0_7, %c0_8], %15 {strides = array<i32>} : memref<8x128xf32, #tpu.memory_space<vmem>>, vector<8x128xf32>,
    return
  }
  func.func @transform_0(%arg0: i32, %arg1: i32, %arg2: i32) -> (i32, i32) {
    %c0_i32 = arith.constant 0 : i32
    return %arg0, %arg2 : i32, i32
  }
  func.func @transform_1(%arg0: i32, %arg1: i32, %arg2: i32) -> (i32, i32) {
    %c0_i32 = arith.constant 0 : i32
    return %arg1, %arg2 : i32, i32
  }
  func.func @transform_2(%arg0: i32, %arg1: i32, %arg2: i32) -> (i32, i32) {
    %c0_i32 = arith.constant 0 : i32
    %c0_i32_0 = arith.constant 0 : i32
    return %c0_i32, %arg1 : i32, i32
  }
  func.func @transform_3(%arg0: i32, %arg1: i32, %arg2: i32) -> (i32, i32) {
    %c0_i32 = arith.constant 0 : i32
    return %arg0, %arg1 : i32, i32
  }
}

</mosaic_0001>

<bundles_post_ra>
// kernel: tpu_custom_call.1
= control target key start
LH: loop header
LB: loop body
LE: loop exit
PB: predicated region body
PF: predicated region fallthrough
CT: control target
= control target key end

     0   :  { %8 = vsyncpa [#allocation3], 0  ;;  %s1426_s0 = inlined_call_operand.hbm [shape: f32[16,512], index: 0, kind: input, shape index: {}]   ;;  %s1427_s1 = inlined_call_operand.hbm [shape: f32[128,512], index: 1, kind: input, shape index: {}]   ;;  %s1428_s2 = inlined_call_operand.vmem [shape: f32[1,128], index: 2, kind: input, shape index: {}]   ;;  %s1429_s3 = inlined_call_operand.hbm [shape: f32[16,128], index: 3, kind: output, shape index: {}]  }
   0x1   :  { %10 = vsyncpa [#allocation3 + $0x1], 0 }
   0x2   :  { %11 = vsyncpa [#allocation6], 0 }
   0x3   :  { %12 = vsyncpa [#allocation4], 0 }
   0x4   :  { %14 = vsyncpa [#allocation4 + $0x1], 0  ;;  %s1012_s12 = smov 0   ;;  %s1014_s13 = smov 0  }
   0x5   :  { %s1016_s14 = smov 0   ;;  %s1018_s15 = smov 0  }
   0x6   :  { %s1020_s16 = smov 0   ;;  %s1022_s17 = smov 0  }
   0x7 LB: > { %s737_s18 = sadd.s32 4294967295, %s985_s17   ;;  %s738_s19 = sadd.s32 4294967294, %s985_s17   ;;  %s985_s17 = sphi %s1022_s17, %s20_s17   ;;  %s981_s16 = sphi %s1020_s16, %s1453_s16   ;;  %s977_s15 = sphi %s1018_s15, %s1452_s15   ;;  %s973_s14 = sphi %s1016_s14, %s1451_s14   ;;  %s969_s13 = sphi %s1014_s13, %s1450_s13   ;;  %s965_s12 = sphi %s1012_s12, %s1449_s12  }
   0x8   : > { %p61_p0 = scmp.ne.s32.totalorder %s969_s13, %s965_s12  ;;  %p1046_p1 = scmp.eq.s32.totalorder %s737_s18, 0 }
   0x9   : > { %p1050_p2 = scmp.eq.s32.totalorder %s737_s18, 1  ;;  %p147_p3 = scmp.eq.s32.totalorder %s738_s19, 1 }
   0xa   : > { %s1434_s20 = scalar_select %p1046_p1, 1, 0 }
   0xb   : > { %s1435_s21 = scalar_select %p1050_p2, 1, 0 }
   0xc   : > { %p1056_p4 = por %p1046_p1, %p61_p0  ;;  %p739_p5 = scmp.ge.s32.totalorder %s985_s17, 1 }
   0xd   : > { %p1061_p6 = por %p147_p3, %p61_p0  ;;  %p154_p7 = scmp.lt.s32.totalorder %s985_s17, 3 }
   0xe   : > { %s1436_s22 = scalar_select %p1056_p4, 1, 0 }
   0xf   : > { %s1437_s23 = scalar_select %p1061_p6, 1, 0 }
  0x10   : > { %p1066_p8 = pnand %p739_p5, %p154_p7  ;;  %s987_s25 = smov [#allocation5]  }
  0x11   : > { %s172_s26 = sshll.u32 %s987_s25, 4  ;;  %s39_s28 = sadd.s32 1, %s981_s16  ;;  %s173_s26 = int_to_ptr.vmem [resolvable:$true] %s172_s26 }
  0x12   : > { %s1438_s24 = scalar_select %p1066_p8, 1, 0 }
  0x13   : > { %p766_p9 = pneg %p1066_p8  ;;  %s841_s4 = scalar_lea.hbm %s1427_s1, 8192 }
  0x14   : > { %p842_p12 = scmp.ne.s32.totalorder %s1427_s1, %s841_s4  ;;  %p848_p5 = scmp.lt.u32.totalorder %s841_s4, %s1427_s1 }
  0x15   : > { %p1075_p11 = pnand %p766_p9, %p1046_p1 }
  0x17   : > { %p843_p13 = pneg %p1075_p11 }
  0x19   : > { %p844_p0 = pnand %p843_p13, %p842_p12 }
  0x1b   : > { %p845_p3 = pneg %p844_p0 }
  0x1d   : > { %p850_p7 = pnand %p848_p5, %p845_p3 }
  0x1f   : > { %853 = shalt.err (!%p850_p7)
}
  0x20   : > { %s854_s9 = scalar_lea.vmem %s173_s26, 8192  ;;  %p862_p1 = scmp.lt.s32.totalorder %s173_s26, %s173_s26 }
  0x21   : > { %p855_p9 = scmp.ne.s32.totalorder %s173_s26, %s854_s9  ;;  %p863_p4 = scmp.lt.s32.totalorder %s854_s9, %s854_s9 }
  0x23   : > { %p857_p10 = pnand %p855_p9, %p843_p13  ;;  %p864_p8 = por %p863_p4, %p862_p1 }
  0x25   : > { %p858_p6 = pneg %p857_p10 }
  0x27   : > { %p865_p2 = pnand %p864_p8, %p858_p6 }
  0x29   : > { %868 = shalt.err (!%p865_p2)
}
  0x2a   : > { %s988_s10 = smov 512   ;;  %s989_s11 = smov 32  }
  0x2b   : > { %769 = dma.hbm_to_vmem [thread:$0]  (!%p1075_p11), %s1427_s1, 8192, %s173_s26, [#allocation6], %s988_s10, %s988_s10, %s989_s11  }
  0x2c   : > { %p41_p1 = scmp.ge.s32.totalorder %s39_s28, 2  ;;  %s48_s25 = sadd.s32 1, %s973_s14 }
  0x2d   : > { %p55_p2 = scmp.ne.s32.totalorder %s973_s14, %s969_s13  ;;  %p56_p4 = scmp.eq.s32.totalorder %s985_s17, 0 }
  0x2e   : > { %s1455_s28 = smov (%p41_p1, %s39_s28), 0  ;;  %p1441_p8 = scmp.ne.s32.totalorder %s1435_s21, 0 }
  0x2f   : > { %p1102_p6 = por %p56_p4, %p55_p2  ;;  %s43_s27 = ssub.s32 %s981_s16, %s1455_s28 }
  0x30   : > { %p1108_p10 = por %p1441_p8, %p55_p2  ;;  %p779_p12 = scmp.lt.s32.totalorder %s985_s17, 2 }
  0x31   : > { %p46_p11 = scmp.eq.s32.totalorder %s43_s27, 0  ;;  %s192_s26 = sand.u32 1, %s973_s14  }
  0x32   : > { %s743_s4 = sshll.u32 %s192_s26, 5  ;;  %s755_s6 = sshll.u32 %s981_s16, 9 }
  0x33   : > { %s1117_s5 = scalar_select %p46_p11, %s973_s14, %s48_s25  }
  0x34   : > { %s1123_s9 = scalar_lea.hbm %s1426_s0, %s755_s6  ;;  %s196_s21 = scalar_lea.vmem [#allocation2], %s743_s4 }
  0x35   : > { %s206_s10 = sshll.u32 %s196_s21, 4  ;;  %p1129_p13 = pnand %p779_p12, %p1102_p6  ;;  %s1125_s10 = int_to_ptr.vmem [resolvable:$true] %s206_s10 }
  0x36   : > { %s193_s18 = scalar_lea.sflag [#allocation3], %s192_s26  ;;  %s869_s19 = scalar_lea.hbm %s1123_s9, 512 }
  0x37   : > { %p870_p0 = scmp.ne.s32.totalorder %s1123_s9, %s869_s19  ;;  %p871_p3 = pneg %p1129_p13 }
  0x38   : > { %s874_s4 = scalar_lea.hbm %s1426_s0, 1024  ;;  %p875_p9 = scmp.lt.u32.totalorder %s1123_s9, %s1426_s0 }
  0x39   : > { %p872_p5 = pnand %p871_p3, %p870_p0  ;;  %p876_p1 = scmp.lt.u32.totalorder %s874_s4, %s869_s19 }
  0x3a   : > { %p878_p4 = scmp.lt.u32.totalorder %s869_s19, %s1123_s9 }
  0x3b   : > { %p873_p7 = pneg %p872_p5  ;;  %p877_p2 = por %p876_p1, %p875_p9 }
  0x3d   : > { %p879_p6 = por %p878_p4, %p877_p2 }
  0x3f   : > { %p880_p8 = pnand %p879_p6, %p873_p7 }
  0x41   : > { %883 = shalt.err (!%p880_p8)
}
  0x42   : > { %s884_s26 = scalar_lea.vmem %s1125_s10, 512  ;;  %s990_s7 = smov [#allocation2]  }
  0x43   : > { %p885_p12 = scmp.ne.s32.totalorder %s1125_s10, %s884_s26  ;;  %s889_s8 = sshll.u32 %s990_s7, 4  ;;  %s890_s8 = int_to_ptr.vmem [resolvable:$false] %s889_s8 }
  0x44   : > { %s891_s21 = scalar_lea.vmem %s890_s8, 1024  ;;  %p892_p5 = scmp.lt.s32.totalorder %s1125_s10, %s890_s8 }
  0x45   : > { %p887_p11 = pnand %p885_p12, %p871_p3  ;;  %p893_p9 = scmp.lt.s32.totalorder %s891_s21, %s884_s26 }
  0x47   : > { %p888_p0 = pneg %p887_p11  ;;  %p894_p1 = por %p893_p9, %p892_p5 }
  0x49   : > { %p895_p2 = pnand %p894_p1, %p888_p0 }
  0x4b   : > { %898 = shalt.err (!%p895_p2)
}
  0x4c   : > { %773 = dma.hbm_to_vmem [thread:$0]  (!%p1129_p13), %s1123_s9, 512, %s1125_s10, %s193_s18  }
  0x4d   : > { %p1444_p7 = scmp.ne.s32.totalorder %s1438_s24, 0 }
  0x4e   : > { %s1161_s19 = sand.u32 (!%p1444_p7), 1, %s969_s13   ;;  %p1445_p3 = scmp.ne.s32.totalorder (!%p1444_p7), %s1436_s22, 0 }
  0x4f   : > { %215 = sbr.rel (%p1444_p7) target bundleno = 390 (0x186), region = 32  ;;  %s747_s25 = sshll.u32 (!%p1444_p7), %s1161_s19, 5 }
  0x50   : > { %s218_s27 = scalar_lea.sflag (!%p1444_p7), [#allocation3], %s1161_s19  ;;  %s1165_s4 = scalar_lea.vmem (!%p1444_p7), [#allocation2], %s747_s25 }
  0x56   : > { %952 = dma.done.wait (%p1445_p3), %s218_s27, 512  }
  0x57   : > { %954 = vsyncadd (%p1445_p3), %s218_s27, 4294966784  ;;  %p1446_p13 = scmp.ne.s32.totalorder %s1434_s20, 0 }
  0x59   : > { %956 = dma.done.wait (%p1446_p13), [#allocation6], 8192  }
  0x5a   : > { %958 = vsyncadd (%p1446_p13), [#allocation6], 4294959104  ;;  %v259_v0 = vld [vmem:[#allocation5 + $0x8] sm:$0xff]  ;;  %v261_v2 = vld [vmem:[#allocation5 + $0x18] sm:$0xff]  ;;  %s749_s20 = sshll.u32 %s1161_s19, 3  ;;  %s752_s9 = sshll.u32 %s977_s15, 7 }
  0x5b   : > { %v263_v1 = vld [vmem:[#allocation5 + $0x28] sm:$0xff]  ;;  %v327_v3 = vmul.f32 %v259_v0, %v259_v0  ;;  %v265_v6 = vld [vmem:[#allocation5 + $0x38] sm:$0xff]  ;;  %v329_v7 = vmul.f32 %v261_v2, %v261_v2  ;;  %v258_v8 = vld [vmem:[#allocation5] sm:$0xff]  ;;  %s250_s10 = scalar_lea.vmem [#allocation7], %s749_s20  ;;  %s1377_s6 = scalar_lea.hbm %s1429_s3, %s752_s9 }
  0x5c   : > { %v331_v4 = vmul.f32 %v263_v1, %v263_v1  ;;  %v491_v5 = vpack.c.bf16 %v263_v1, %v259_v0  ;;  %v262_v9 = vld [vmem:[#allocation5 + $0x20] sm:$0xff]  ;;  %v333_v10 = vmul.f32 %v265_v6, %v265_v6  ;;  %v493_v11 = vpack.c.bf16 %v265_v6, %v261_v2  ;;  %v260_v14 = vld [vmem:[#allocation5 + $0x10] sm:$0xff]  ;;  %v267_v16 = vld [vmem:[#allocation5 + $0x48] sm:$0xff]  ;;  %s625_s11 = sshll.u32 %s250_s10, 4  ;;  %s611_s15 = scalar_lea.sflag [#allocation4], %s1161_s19  ;;  %s1379_s11 = int_to_ptr.vmem [resolvable:$true] %s625_s11 }
  0x5d   : > { %v326_v12 = vmul.f32 %v258_v8, %v258_v8  ;;  %v330_v13 = vmul.f32 %v262_v9, %v262_v9  ;;  %v264_v15 = vld [vmem:[#allocation5 + $0x30] sm:$0xff]  ;;  %v490_v18 = vpack.c.bf16 %v262_v9, %v258_v8  ;;  %v328_v19 = vmul.f32 %v260_v14, %v260_v14  ;;  %v271_v21 = vld [vmem:[#allocation5 + $0x68] sm:$0xff]  ;;  %v269_v22 = vld [vmem:[#allocation5 + $0x58] sm:$0xff]  ;;  %s899_s26 = scalar_lea.vmem %s1379_s11, 128  ;;  %s991_s7 = smov [#allocation7]  }
  0x5e   : > { %v411_v17 = vadd.f32 %v331_v4, %v327_v3  ;;  %529 = vmatprep.subr.bf16.mxu1 %v491_v5  ;;  %v332_v20 = vmul.f32 %v264_v15, %v264_v15  ;;  %v273_v23 = vld [vmem:[#allocation5 + $0x78] sm:$0xff]  ;;  %v453_v24 = vadd.f32 %v333_v10, %v329_v7  ;;  %569 = vmatprep.subr.bf16.mxu0 %v493_v11  ;;  %v266_v28 = vld [vmem:[#allocation5 + $0x40] sm:$0xff]  ;;  %v268_v30 = vld [vmem:[#allocation5 + $0x50] sm:$0xff]  ;;  %p900_p4 = scmp.ne.s32.totalorder %s1379_s11, %s899_s26  ;;  %s903_s8 = sshll.u32 %s991_s7, 4  ;;  %s904_s8 = int_to_ptr.vmem [resolvable:$false] %s903_s8 }
  0x5f   : > { %v390_v25 = vadd.f32 %v330_v13, %v326_v12  ;;  %v492_v26 = vpack.c.bf16 %v264_v15, %v260_v14  ;;  %v335_v27 = vmul.f32 %v267_v16, %v267_v16  ;;  %v270_v29 = vld [vmem:[#allocation5 + $0x60] sm:$0xff]  ;;  %530 = vmatpush1.bf16.xpose.msra.mxu1 %v490_v18  ;;  %v339_v32 = vmul.f32 %v271_v21, %v271_v21  ;;  %v272_v35 = vld [vmem:[#allocation5 + $0x70] sm:$0xff]  ;;  %v275_v40 = vld [vmem:[#allocation5 + $0x88] sm:$0xff]  ;;  %s905_s21 = scalar_lea.vmem %s904_s8, 256  ;;  %p906_p12 = scmp.lt.s32.totalorder %s1379_s11, %s904_s8 }
  0x60   : > { %v432_v31 = vadd.f32 %v332_v20, %v328_v19  ;;  %v495_v33 = vpack.c.bf16 %v271_v21, %v267_v16  ;;  %v337_v34 = vmul.f32 %v269_v22, %v269_v22  ;;  %v341_v37 = vmul.f32 %v273_v23, %v273_v23  ;;  %v279_v41 = vld [vmem:[#allocation5 + $0xa8] sm:$0xff]  ;;  %v277_v46 = vld [vmem:[#allocation5 + $0x98] sm:$0xff]  ;;  %v1175_v52 = vld [vmem:[#allocation5 + $0x80] sm:$0xff]  ;;  %p901_p6 = pnand %p900_p4, %p1108_p10  ;;  %p907_p11 = scmp.lt.s32.totalorder %s905_s21, %s899_s26 }
  0x61   : > { %570 = vmatpush1.bf16.xpose.msra.mxu0 %v492_v26  ;;  %v412_v36 = vadd.f32 %v411_v17, %v335_v27  ;;  %v497_v38 = vpack.c.bf16 %v273_v23, %v269_v22  ;;  %v334_v39 = vmul.f32 %v266_v28, %v266_v28  ;;  %v338_v43 = vmul.f32 %v270_v29, %v270_v29  ;;  %v281_v47 = vld [vmem:[#allocation5 + $0xb8] sm:$0xff]  ;;  %v278_v57 = vld [vmem:[#allocation5 + $0xa0] sm:$0xff]  ;;  %v1177_v58 = vld [vmem:[#allocation5 + $0x90] sm:$0xff] }
  0x62   : > { %531 = vmatprep.subr.bf16.mxu1 %v495_v33  ;;  %v454_v42 = vadd.f32 %v453_v24, %v337_v34  ;;  %v494_v44 = vpack.c.bf16 %v270_v29, %v266_v28  ;;  %v336_v45 = vmul.f32 %v268_v30, %v268_v30  ;;  %v340_v50 = vmul.f32 %v272_v35, %v272_v35  ;;  %v280_v63 = vld [vmem:[#allocation5 + $0xb0] sm:$0xff]  ;;  %v283_v4 = vld [vmem:[#allocation5 + $0xc8] sm:$0xff]  ;;  %v285_v9 = vld [vmem:[#allocation5 + $0xd8] sm:$0xff]  ;;  %p902_p8 = pneg %p901_p6  ;;  %p908_p0 = por %p907_p11, %p906_p12 }
  0x63   : > { %v413_v48 = vadd.f32 %v412_v36, %v339_v32  ;;  %571 = vmatprep.subr.bf16.mxu0 %v497_v38  ;;  %v391_v49 = vadd.f32 %v390_v25, %v334_v39  ;;  %v496_v51 = vpack.c.bf16 %v272_v35, %v268_v30  ;;  %v343_v55 = vmul.f32 %v275_v40, %v275_v40  ;;  %v287_v8 = vld [vmem:[#allocation5 + $0xe8] sm:$0xff]  ;;  %v289_v13 = vld [vmem:[#allocation5 + $0xf8] sm:$0xff]  ;;  %v1183_v17 = vld [vmem:[#allocation5 + $0xc0] sm:$0xff] }
  0x64   : > { %v455_v53 = vadd.f32 %v454_v42, %v341_v37  ;;  %v433_v54 = vadd.f32 %v432_v31, %v336_v45  ;;  %v347_v56 = vmul.f32 %v279_v41, %v279_v41  ;;  %v499_v60 = vpack.c.bf16 %v279_v41, %v275_v40  ;;  %v1185_v18 = vld [vmem:[#allocation5 + $0xe0] sm:$0xff]  ;;  %v1188_v23 = vld [vmem:[#allocation5 + $0xd0] sm:$0xff]  ;;  %v1193_v29 = vld [vmem:[#allocation5 + $0x108] sm:$0xff]  ;;  %p909_p5 = pnand %p908_p0, %p902_p8 }
  0x65   : > { %v392_v59 = vadd.f32 %v391_v49, %v338_v43  ;;  %v345_v61 = vmul.f32 %v277_v46, %v277_v46  ;;  %v349_v62 = vmul.f32 %v281_v47, %v281_v47  ;;  %v414_v1 = vadd.f32 %v413_v48, %v343_v55  ;;  %v1190_v24 = vld [vmem:[#allocation5 + $0xf0] sm:$0xff]  ;;  %v1195_v30 = vld [vmem:[#allocation5 + $0x128] sm:$0xff]  ;;  %v1201_v35 = vld [vmem:[#allocation5 + $0x118] sm:$0xff] }
  0x66   : > { %v434_v0 = vadd.f32 %v433_v54, %v340_v50  ;;  %v501_v2 = vpack.c.bf16 %v281_v47, %v277_v46  ;;  %v342_v3 = vmul.f32 %v1175_v52, %v1175_v52  ;;  %v346_v6 = vmul.f32 %v278_v57, %v278_v57  ;;  %v1203_v36 = vld [vmem:[#allocation5 + $0x138] sm:$0xff]  ;;  %v1209_v41 = vld [vmem:[#allocation5 + $0x100] sm:$0xff]  ;;  %v1221_v50 = vld [vmem:[#allocation5 + $0x110] sm:$0xff] }
  0x67   : > { %v456_v5 = vadd.f32 %v455_v53, %v345_v61  ;;  %v344_v7 = vmul.f32 %v1177_v58, %v1177_v58  ;;  %532 = vmatpush1.bf16.xpose.msra.mxu1 %v494_v44  ;;  %v415_v10 = vadd.f32 %v414_v1, %v347_v56  ;;  %v348_v12 = vmul.f32 %v280_v63, %v280_v63  ;;  %v1215_v46 = vld [vmem:[#allocation5 + $0x120] sm:$0xff]  ;;  %v1225_v54 = vld [vmem:[#allocation5 + $0x130] sm:$0xff]  ;;  %v1227_v55 = vld [vmem:[#allocation5 + $0x148] sm:$0xff] }
  0x68   : > { %v393_v11 = vadd.f32 %v392_v59, %v342_v3  ;;  %533 = vmatprep.subr.bf16.mxu1 %v499_v60  ;;  %v351_v16 = vmul.f32 %v283_v4, %v283_v4  ;;  %v498_v20 = vpack.c.bf16 %v278_v57, %v1175_v52  ;;  %v355_v21 = vmul.f32 %v287_v8, %v287_v8  ;;  %v1231_v59 = vld [vmem:[#allocation5 + $0x168] sm:$0xff] }
  0x69   : > { %572 = vmatpush1.bf16.xpose.msra.mxu0 %v496_v51  ;;  %v457_v14 = vadd.f32 %v456_v5, %v349_v62  ;;  %v435_v15 = vadd.f32 %v434_v0, %v344_v7  ;;  %v353_v22 = vmul.f32 %v285_v9, %v285_v9  ;;  %v500_v26 = vpack.c.bf16 %v280_v63, %v1177_v58  ;;  %v1235_v63 = vld [vmem:[#allocation5 + $0x158] sm:$0xff]  ;;  %v1245_v5 = vld [vmem:[#allocation5 + $0x140] sm:$0xff] }
  0x6a   : > { %573 = vmatprep.subr.bf16.mxu0 %v501_v2  ;;  %v394_v19 = vadd.f32 %v393_v11, %v346_v6  ;;  %v416_v27 = vadd.f32 %v415_v10, %v351_v16  ;;  %v357_v28 = vmul.f32 %v289_v13, %v289_v13  ;;  %v503_v31 = vpack.c.bf16 %v287_v8, %v283_v4  ;;  %v1237_v0 = vld [vmem:[#allocation5 + $0x178] sm:$0xff]  ;;  %v1247_v6 = vld [vmem:[#allocation5 + $0x160] sm:$0xff]  ;;  %v1253_v11 = vld [vmem:[#allocation5 + $0x150] sm:$0xff] }
  0x6b   : > { %v436_v25 = vadd.f32 %v435_v15, %v348_v12  ;;  %v458_v32 = vadd.f32 %v457_v14, %v353_v22  ;;  %v350_v33 = vmul.f32 %v1183_v17, %v1183_v17  ;;  %v354_v34 = vmul.f32 %v1185_v18, %v1185_v18  ;;  %v1255_v12 = vld [vmem:[#allocation5 + $0x170] sm:$0xff] }
  0x6c   : > { %v417_v37 = vadd.f32 %v416_v27, %v355_v21  ;;  %v505_v38 = vpack.c.bf16 %v289_v13, %v285_v9  ;;  %v352_v39 = vmul.f32 %v1188_v23, %v1188_v23  ;;  %v356_v40 = vmul.f32 %v1190_v24, %v1190_v24  ;;  %v1277_v27 = vld [vmem:[#allocation5 + $0x198] sm:$0xff] }
  0x6d   : > { %v459_v42 = vadd.f32 %v458_v32, %v357_v28  ;;  %v395_v43 = vadd.f32 %v394_v19, %v350_v33  ;;  %v359_v44 = vmul.f32 %v1193_v29, %v1193_v29  ;;  %v363_v45 = vmul.f32 %v1195_v30, %v1195_v30  ;;  %v1279_v28 = vld [vmem:[#allocation5 + $0x1b8] sm:$0xff]  ;;  %v1285_v32 = vld [vmem:[#allocation5 + $0x180] sm:$0xff] }
  0x6e   : > { %v437_v47 = vadd.f32 %v436_v25, %v352_v39  ;;  %v361_v48 = vmul.f32 %v1201_v35, %v1201_v35  ;;  %v365_v49 = vmul.f32 %v1203_v36, %v1203_v36  ;;  %v358_v53 = vmul.f32 %v1209_v41, %v1209_v41  ;;  %v1287_v33 = vld [vmem:[#allocation5 + $0x1a0] sm:$0xff] }
  0x6f   : > { %534 = vmatpush1.bf16.xpose.msra.mxu1 %v498_v20  ;;  %v396_v51 = vadd.f32 %v395_v43, %v354_v34  ;;  %v418_v52 = vadd.f32 %v417_v37, %v359_v44  ;;  %v362_v58 = vmul.f32 %v1215_v46, %v1215_v46  ;;  %v360_v62 = vmul.f32 %v1221_v50, %v1221_v50  ;;  %v1297_v43 = vld [vmem:[#allocation5 + $0x1c8] sm:$0xff] }
  0x70   : > { %535 = vmatprep.subr.bf16.mxu1 %v503_v31  ;;  %v438_v56 = vadd.f32 %v437_v47, %v356_v40  ;;  %v460_v57 = vadd.f32 %v459_v42, %v361_v48  ;;  %v502_v1 = vpack.c.bf16 %v1185_v18, %v1183_v17  ;;  %v364_v3 = vmul.f32 %v1225_v54, %v1225_v54  ;;  %v1263_v17 = vld [vmem:[#allocation5 + $0x188] sm:$0xff]  ;;  %v1295_v42 = vld [vmem:[#allocation5 + $0x1b0] sm:$0xff] }
  0x71   : > { %574 = vmatpush1.bf16.xpose.msra.mxu0 %v500_v26  ;;  %v419_v60 = vadd.f32 %v418_v52, %v363_v45  ;;  %v397_v61 = vadd.f32 %v396_v51, %v358_v53  ;;  %v367_v4 = vmul.f32 %v1227_v55, %v1227_v55  ;;  %v504_v7 = vpack.c.bf16 %v1190_v24, %v1188_v23  ;;  %v1265_v18 = vld [vmem:[#allocation5 + $0x1a8] sm:$0xff] }
  0x72   : > { %575 = vmatprep.subr.bf16.mxu0 %v505_v38  ;;  %v461_v2 = vadd.f32 %v460_v57, %v365_v49  ;;  %v439_v9 = vadd.f32 %v438_v56, %v360_v62  ;;  %v371_v10 = vmul.f32 %v1231_v59, %v1231_v59  ;;  %v507_v13 = vpack.c.bf16 %v1195_v30, %v1193_v29  ;;  %v1305_v49 = vld [vmem:[#allocation5 + $0x1e8] sm:$0xff]  ;;  %v1311_v57 = vld [vmem:[#allocation5 + $0x1d8] sm:$0xff] }
  0x73   : > { %v398_v8 = vadd.f32 %v397_v61, %v362_v58  ;;  %v420_v14 = vadd.f32 %v419_v60, %v367_v4  ;;  %v369_v15 = vmul.f32 %v1235_v63, %v1235_v63  ;;  %v373_v16 = vmul.f32 %v1237_v0, %v1237_v0 }
  0x74   : > { %v509_v19 = vpack.c.bf16 %v1203_v36, %v1201_v35  ;;  %v440_v20 = vadd.f32 %v439_v9, %v364_v3  ;;  %v366_v21 = vmul.f32 %v1245_v5, %v1245_v5  ;;  %v370_v22 = vmul.f32 %v1247_v6, %v1247_v6  ;;  %v1289_v36 = vld [vmem:[#allocation5 + $0x190] sm:$0xff] }
  0x75   : > { %v421_v23 = vadd.f32 %v420_v14, %v371_v10  ;;  %v462_v24 = vadd.f32 %v461_v2, %v369_v15  ;;  %v368_v25 = vmul.f32 %v1253_v11, %v1253_v11  ;;  %v372_v26 = vmul.f32 %v1255_v12, %v1255_v12  ;;  %v1335_v9 = vld [vmem:[#allocation5 + $0x1f0] sm:$0xff] }
  0x76   : > { %v399_v29 = vadd.f32 %v398_v8, %v366_v21  ;;  %v375_v30 = vmul.f32 %v1263_v17, %v1263_v17  ;;  %v379_v31 = vmul.f32 %v1265_v18, %v1265_v18  ;;  %v377_v39 = vmul.f32 %v1277_v27, %v1277_v27  ;;  %v1333_v8 = vld [vmem:[#allocation5 + $0x1d0] sm:$0xff] }
  0x77   : > { %536 = vmatpush1.bf16.xpose.msra.mxu1 %v502_v1  ;;  %v463_v34 = vadd.f32 %v462_v24, %v373_v16  ;;  %v441_v35 = vadd.f32 %v440_v20, %v368_v25  ;;  %v381_v40 = vmul.f32 %v1279_v28, %v1279_v28  ;;  %v506_v44 = vpack.c.bf16 %v1215_v46, %v1209_v41  ;;  %v1313_v41 = vld [vmem:[#allocation5 + $0x1f8] sm:$0xff] }
  0x78   : > { %537 = vmatprep.subr.bf16.mxu1 %v507_v13  ;;  %v400_v37 = vadd.f32 %v399_v29, %v370_v22  ;;  %v422_v38 = vadd.f32 %v421_v23, %v375_v30  ;;  %v374_v47 = vmul.f32 %v1285_v32, %v1285_v32  ;;  %v378_v48 = vmul.f32 %v1287_v33, %v1287_v33 }
  0x79   : > { %576 = vmatpush1.bf16.xpose.msra.mxu0 %v504_v7  ;;  %v442_v45 = vadd.f32 %v441_v35, %v372_v26  ;;  %v508_v51 = vpack.c.bf16 %v1225_v54, %v1221_v50  ;;  %v464_v53 = vadd.f32 %v463_v34, %v377_v39  ;;  %v376_v56 = vmul.f32 %v1289_v36, %v1289_v36  ;;  %v1321_v50 = vld [vmem:[#allocation5 + $0x1c0] sm:$0xff] }
  0x7a   : > { %577 = vmatprep.subr.bf16.mxu0 %v509_v19  ;;  %v423_v52 = vadd.f32 %v422_v38, %v379_v31  ;;  %v511_v46 = vpack.c.bf16 %v1231_v59, %v1227_v55  ;;  %v401_v58 = vadd.f32 %v400_v37, %v374_v47  ;;  %v380_v60 = vmul.f32 %v1295_v42, %v1295_v42  ;;  %v1323_v54 = vld [vmem:[#allocation5 + $0x1e0] sm:$0xff] }
  0x7b   : > { %v383_v61 = vmul.f32 %v1297_v43, %v1297_v43  ;;  %v513_v62 = vpack.c.bf16 %v1237_v0, %v1235_v63  ;;  %v465_v1 = vadd.f32 %v464_v53, %v381_v40  ;;  %v443_v2 = vadd.f32 %v442_v45, %v376_v56 }
  0x7c   : > { %v387_v3 = vmul.f32 %v1305_v49, %v1305_v49  ;;  %v402_v55 = vadd.f32 %v401_v58, %v378_v48  ;;  %v385_v4 = vmul.f32 %v1311_v57, %v1311_v57  ;;  %v389_v7 = vmul.f32 %v1313_v41, %v1313_v41 }
  0x7d   : > { %v424_v59 = vadd.f32 %v423_v52, %v383_v61  ;;  %v444_v10 = vadd.f32 %v443_v2, %v380_v60  ;;  %v382_v63 = vmul.f32 %v1321_v50, %v1321_v50  ;;  %v386_v0 = vmul.f32 %v1323_v54, %v1323_v54  ;;  %v322_v2 = vld [vmem:[%s1165_s4] sm:$0xff] }
  0x7e   : > { %v466_v14 = vadd.f32 %v465_v1, %v385_v4  ;;  %v384_v16 = vmul.f32 %v1333_v8, %v1333_v8  ;;  %v388_v19 = vmul.f32 %v1335_v9, %v1335_v9  ;;  %v510_v22 = vpack.c.bf16 %v1247_v6, %v1245_v5 }
  0x7f   : > { %538 = vmatpush1.bf16.xpose.msra.mxu1 %v506_v44  ;;  %v425_v13 = vadd.f32 %v424_v59, %v387_v3  ;;  %v403_v15 = vadd.f32 %v402_v55, %v382_v63  ;;  %v512_v25 = vpack.c.bf16 %v1255_v12, %v1253_v11  ;;  %v515_v26 = vpack.c.bf16 %v1265_v18, %v1263_v17 }
  0x80   : > { %539 = vmatprep.subr.bf16.mxu1 %v511_v46  ;;  %v467_v21 = vadd.f32 %v466_v14, %v389_v7  ;;  %v445_v24 = vadd.f32 %v444_v10, %v384_v16  ;;  %v517_v31 = vpack.c.bf16 %v1279_v28, %v1277_v27  ;;  %v514_v44 = vpack.c.bf16 %v1287_v33, %v1285_v32  ;;  %v324_v7 = vld [vmem:[%s1165_s4 + $0x10] sm:$0xff] }
  0x81   : > { %578 = vmatpush1.bf16.xpose.msra.mxu0 %v508_v51  ;;  %v426_v20 = vrot.slane %v425_v13, 4  ;;  %v404_v23 = vadd.f32 %v403_v15, %v386_v0  ;;  %v516_v45 = vpack.c.bf16 %v1295_v42, %v1289_v36  ;;  %v519_v47 = vpack.c.bf16 %v1305_v49, %v1297_v43  ;;  %v750_v0 = vld [vmem:[%s1428_s2] ss:$0 sm:$0xff] }
  0x82   : > { %579 = vmatprep.subr.bf16.mxu0 %v513_v62  ;;  %v468_v30 = vrot.slane %v467_v21, 4  ;;  %v446_v35 = vadd.f32 %v445_v24, %v388_v19  ;;  %v521_v52 = vpack.c.bf16 %v1313_v41, %v1311_v57  ;;  %v518_v43 = vpack.c.bf16 %v1323_v54, %v1321_v50  ;;  %v323_v41 = vld [vmem:[%s1165_s4 + $0x8] sm:$0xff]  ;;  %v325_v62 = vld [vmem:[%s1165_s4 + $0x18] sm:$0xff] }
  0x83   : > { %v427_v29 = vadd.f32 %v426_v20, %v425_v13  ;;  %v405_v34 = vrot.slane %v404_v23, 4  ;;  %v520_v57 = vpack.c.bf16 %v1335_v9, %v1333_v8 }
  0x84   : > { %v469_v38 = vadd.f32 %v468_v30, %v467_v21  ;;  %v447_v5 = vrot.slane %v446_v35, 4 }
  0x85   : > { %v428_v37 = vrot.slane %v427_v29, 2  ;;  %v406_v39 = vadd.f32 %v405_v34, %v404_v23 }
  0x86   : > { %v470_v40 = vrot.slane %v469_v38, 2  ;;  %v448_v12 = vadd.f32 %v447_v5, %v446_v35 }
  0x87   : > { %540 = vmatpush1.bf16.xpose.msra.mxu1 %v510_v22  ;;  %v429_v6 = vadd.f32 %v428_v37, %v427_v29  ;;  %v407_v11 = vrot.slane %v406_v39, 2 }
  0x88   : > { %541 = vmatprep.subr.bf16.mxu1 %v515_v26  ;;  %v471_v18 = vadd.f32 %v470_v40, %v469_v38  ;;  %v449_v28 = vrot.slane %v448_v12, 2 }
  0x89   : > { %580 = vmatpush1.bf16.xpose.msra.mxu0 %v512_v25  ;;  %v430_v17 = vrot.slane %v429_v6, 1  ;;  %v408_v27 = vadd.f32 %v407_v11, %v406_v39 }
  0x8a   : > { %581 = vmatprep.subr.bf16.mxu0 %v517_v31  ;;  %v472_v48 = vrot.slane %v471_v18, 1  ;;  %v450_v56 = vadd.f32 %v449_v28, %v448_v12 }
  0x8b   : > { %v431_v51 = vadd.f32 %v430_v17, %v429_v6  ;;  %v409_v53 = vrot.slane %v408_v27, 1 }
  0x8c   : > { %v473_v58 = vadd.f32 %v472_v48, %v471_v18  ;;  %v451_v32 = vrot.slane %v450_v56, 1 }
  0x8d   : > { %v475_v46 = vadd.f32 1e-12, %v431_v51  ;;  %v410_v60 = vadd.f32 %v409_v53, %v408_v27 }
  0x8e   : > { %v477_v33 = vadd.f32 1e-12, %v473_v58  ;;  %v452_v42 = vadd.f32 %v451_v32, %v450_v56 }
  0x8f   : > { %542 = vmatpush1.bf16.xpose.msra.mxu1 %v514_v44  ;;  %833 = vrsqrt.f32 %v475_v46  ;;  %v474_v36 = vadd.f32 1e-12, %v410_v60 }
  0x90   : > { %543 = vmatprep.subr.bf16.mxu1 %v519_v47  ;;  %835 = vrsqrt.f32 %v477_v33  ;;  %v476_v49 = vadd.f32 1e-12, %v452_v42 }
  0x91   : > { %582 = vmatpush1.bf16.xpose.msra.mxu0 %v516_v45  ;;  %837 = vrsqrt.f32 %v474_v36 }
  0x92   : > { %583 = vmatprep.subr.bf16.mxu0 %v521_v52  ;;  %839 = vrsqrt.f32 %v476_v49 }
  0x97   : > { %544 = vmatpush1.bf16.xpose.msra.mxu1 %v518_v43 }
  0x99   : > { %584 = vmatpush1.bf16.xpose.msra.mxu0 %v520_v57  ;;  %v834_v61 = vpop.eup %833 }
  0x9a   : > { %v483_v1 = vmul.f32 %v834_v61, %v323_v41  ;;  %v836_v3 = vpop.eup %835 }
  0x9b   : > { %v838_v55 = vpop.eup %837  ;;  %v485_v4 = vmul.f32 %v836_v3, %v325_v62 }
  0x9c   : > { %v487_v59 = vpack.c.bf16 %v483_v1, %v483_v1  ;;  %v482_v50 = vmul.f32 %v838_v55, %v322_v2  ;;  %v840_v54 = vpop.eup %839 }
  0x9d   : > { %v489_v10 = vpack.c.bf16 %v485_v4, %v485_v4  ;;  %v484_v9 = vmul.f32 %v840_v54, %v324_v7 }
  0x9e   : > { %561 = vmatprep.mubr.bf16.mxu1 %v487_v59  ;;  %v486_v8 = vpack.c.bf16 %v482_v50, %v482_v50 }
  0x9f   : > { %601 = vmatprep.mubr.bf16.mxu0 %v489_v10  ;;  %v488_v63 = vpack.c.bf16 %v484_v9, %v484_v9 }
  0xa0   : > { %562 = vmatmul.mubr.bf16.vlgmr.msra.gmra.mrb[0].mxu1 %v486_v8 }
  0xa1   : > { %602 = vmatmul.mubr.bf16.vlgmr.msra.gmra.mrb[0].mxu0 %v488_v63 }
 0x173   : > { %v563_v13 = vpop.f32.mrb[0].mxu1 }
 0x174   : > { %v564_v14 = vadd.f32 %v750_v0, %v563_v13  ;;  %v565_v15 = vpop.f32.mrb[1].mxu1  ;;  %v603_v16 = vpop.f32.mrb[0].mxu0 }
 0x175   : > { %v566_v19 = vpop.f32.mrb[2].mxu1  ;;  %v605_v21 = vpop.f32.mrb[1].mxu0 }
 0x176   : > { %v604_v20 = vadd.f32 %v603_v16, %v564_v14  ;;  %v567_v22 = vpop.f32.mrb[3].mxu1  ;;  %v606_v23 = vpop.f32.mrb[2].mxu0 }
 0x177   : > { %v607_v24 = vpop.f32.mrb[3].mxu0 }
 0x178   : > { %609 = vst [vmem:[%s250_s10] sm:$0xff] %v604_v20 }
 0x179   : > { %912 = shalt.err (!%p909_p5)
}
 0x17a   : > { %s913_s19 = scalar_lea.hbm %s1377_s6, 128  ;;  %s917_s4 = scalar_lea.hbm %s1429_s3, 256 }
 0x17b   : > { %p914_p9 = scmp.ne.s32.totalorder %s1377_s6, %s913_s19  ;;  %p918_p7 = scmp.lt.u32.totalorder %s1377_s6, %s1429_s3 }
 0x17c   : > { %p919_p3 = scmp.lt.u32.totalorder %s917_s4, %s913_s19  ;;  %p921_p4 = scmp.lt.u32.totalorder %s913_s19, %s1377_s6 }
 0x17d   : > { %p915_p1 = pnand %p914_p9, %p1108_p10 }
 0x17e   : > { %p920_p13 = por %p919_p3, %p918_p7 }
 0x17f   : > { %p916_p2 = pneg %p915_p1 }
 0x180   : > { %p922_p6 = por %p921_p4, %p920_p13 }
 0x182   : > { %p923_p8 = pnand %p922_p6, %p916_p2 }
 0x184   : > { %926 = shalt.err (!%p923_p8)
}
 0x185   : > { %764 = dma.vmem_to_hbm [thread:$0]  (%p1108_p10), %s1379_s11, 128, %s1377_s6, %s611_s15  }
 0x186 PF: > { %s637_s24 = sand.u32 1, %s965_s12   ;;  %p1447_p12 = scmp.ne.s32.totalorder %s1437_s23, 0 }
 0x187   : > { %p1448_p11 = scmp.ge.s32.totalorder %s985_s17, 2  ;;  %s638_s9 = scalar_lea.sflag [#allocation4], %s637_s24 }
 0x189   : > { %p775_p0 = pnand %p1448_p11, %p1447_p12 }
 0x18b   : > { %960 = dma.done.wait (!%p775_p0), %s638_s9, 128  }
 0x18c   : > { %962 = vsyncadd (!%p775_p0), %s638_s9, 4294967168  ;;  %s20_s17 = sadd.s32 1, %s985_s17   ;;  %s1449_s12 = smov %s969_s13 }
 0x18d   : > { %p17_p5 = scmp.ge.s32.totalorder %s20_s17, 4   ;;  %s1450_s13 = smov %s973_s14 }
 0x18e   : > { %s1451_s14 = smov %s1117_s5  ;;  %s1452_s15 = smov %s981_s16 }
 0x18f   : > { %s1453_s16 = smov %s1455_s28  ;;  %19 = sbr.rel (!%p17_p5) target bundleno = 7 (0x7), region = 85 }
 0x196   :  { %643 = vsyncpa [#allocation3], 1 }
 0x197   :  { %645 = vsyncpa [#allocation3 + $0x1], 1 }
 0x198   :  { %646 = vsyncpa [#allocation6], 1 }
 0x199   :  { %647 = vsyncpa [#allocation4], 1 }
 0x19a   :  { %649 = vsyncpa [#allocation4 + $0x1], 1 }

</bundles_post_ra>
